<compile_context>
chip_gen: v6e
topology: v6e:2x2x1
jax: 0.10.0
libtpu: 0.0.40
codegen_flags: <defaults>
</compile_context>

<pallas_src>
import functools
import math

import jax
import jax.numpy as jnp
from jax.experimental import pallas as pl
from jax.experimental.pallas import tpu as pltpu


def _ff_body(x_ref, w1_ref, b1_ref, w2_ref, b2_ref, o_ref, bits_ref, threshold, scale):
    # x_ref:   (1, C, TS)   current batch / seq tile (lane-dense along TS)
    # w1_ref:  (H, C)       torch lin1.weight, resident
    # b1_ref:  (H, 1)
    # w2_ref:  (C, H)       torch lin2.weight, resident
    # b2_ref:  (C, 1)
    # bits_ref:(1, H, TS)   uint32 dropout bits (only in training mode)
    # o_ref:   (1, C, TS)
    x = x_ref[0]                                               # (C, TS)

    # lin1: h^T = w1 @ x  -> (H, TS), f32 accumulation on the MXU.
    h = jnp.dot(w1_ref[...], x, preferred_element_type=jnp.float32)
    h = h + b1_ref[...].astype(jnp.float32)                    # broadcast over lanes
    h = jnp.maximum(h, 0.0)

    if bits_ref is not None:
        # Inverted dropout: keep where bits >= threshold (keep prob = 1 - p),
        # fold the 1/(1-p) rescale into the select constant.
        keep = bits_ref[0] >= jnp.uint32(threshold)
        h = h * jnp.where(keep, jnp.float32(scale), jnp.float32(0.0))

    # lin2: y^T = w2 @ h -> (C, TS); feed the MXU in the weight dtype.
    h = h.astype(w2_ref.dtype)
    y = jnp.dot(w2_ref[...], h, preferred_element_type=jnp.float32)
    y = y + b2_ref[...].astype(jnp.float32)
    o_ref[0] = y.astype(o_ref.dtype)


def _ff_kernel_eval(x_ref, w1_ref, b1_ref, w2_ref, b2_ref, o_ref):
    _ff_body(x_ref, w1_ref, b1_ref, w2_ref, b2_ref, o_ref, None, 0, 1.0)


def _ff_kernel_train(x_ref, w1_ref, b1_ref, w2_ref, b2_ref, bits_ref, o_ref,
                     *, threshold, scale):
    _ff_body(x_ref, w1_ref, b1_ref, w2_ref, b2_ref, o_ref, bits_ref, threshold, scale)


def _pick_seq_tile(S):
    """Sequence-tile size: full S when small, else a lane-aligned 128/256/512 tile."""
    if S < 128:
        return S
    for cand in (512, 256, 128):
        if cand <= S:
            return cand
    return 128


def feed_forward(x, w1, b1, w2, b2, *, drop_rate=0.0, rng_key=None):
    """x: (B, io_size, seq). Weights in torch convention: w1 (H, IO), w2 (IO, H)."""
    B, C, S = x.shape
    H = w1.shape[0]
    if not (0.0 <= float(drop_rate) < 1.0):
        raise ValueError("drop_rate must be in [0, 1).")
    training = float(drop_rate) > 0.0

    TS = _pick_seq_tile(S)
    S_pad = ((S + TS - 1) // TS) * TS
    n_tiles = S_pad // TS
    if S_pad != S:
        x = jnp.pad(x, ((0, 0), (0, 0), (0, S_pad - S)))

    # Weights resident in VMEM; keep MXU operands in the activation dtype.
    w1c = w1.astype(x.dtype)                      # (H, C)
    w2c = w2.astype(x.dtype)                      # (C, H)
    b1r = b1.reshape(H, 1)
    b2r = b2.reshape(C, 1)

    x_spec = pl.BlockSpec((1, C, TS), lambda b, i: (b, 0, i))
    w1_spec = pl.BlockSpec((H, C), lambda b, i: (0, 0))
    b1_spec = pl.BlockSpec((H, 1), lambda b, i: (0, 0))
    w2_spec = pl.BlockSpec((C, H), lambda b, i: (0, 0))
    b2_spec = pl.BlockSpec((C, 1), lambda b, i: (0, 0))
    out_spec = pl.BlockSpec((1, C, TS), lambda b, i: (b, 0, i))

    in_specs = [x_spec, w1_spec, b1_spec, w2_spec, b2_spec]
    inputs = [x, w1c, b1r, w2c, b2r]

    if training:
        if rng_key is None:
            rng_key = jax.random.PRNGKey(0)
        # Portable dropout randomness (works on TPU and in interpret mode).
        bits = jax.random.bits(rng_key, (B, H, S_pad), dtype=jnp.uint32)
        threshold = min(int(float(drop_rate) * 4294967296.0), 4294967295)
        scale = 1.0 / (1.0 - float(drop_rate))
        kernel = functools.partial(_ff_kernel_train, threshold=threshold, scale=scale)
        in_specs.append(pl.BlockSpec((1, H, TS), lambda b, i: (b, 0, i)))
        inputs.append(bits)
    else:
        kernel = _ff_kernel_eval

    itemsize = jnp.dtype(x.dtype).itemsize
    bytes_accessed = (
        2 * B * C * S_pad * itemsize            # x in + y out
        + (H * C + C * H + H + C) * itemsize    # weights + biases
        + (B * H * S_pad * 4 if training else 0)
    )
    cost = pl.CostEstimate(
        flops=4 * B * S_pad * C * H,            # two matmuls
        transcendentals=0,
        bytes_accessed=bytes_accessed,
    )

    out = pl.pallas_call(
        kernel,
        out_shape=jax.ShapeDtypeStruct((B, C, S_pad), x.dtype),
        grid=(B, n_tiles),
        in_specs=in_specs,
        out_specs=out_spec,
        compiler_params=pltpu.CompilerParams(
            dimension_semantics=("parallel", "parallel"),
            vmem_limit_bytes=64 * 1024 * 1024,
        ),
        cost_estimate=cost,
    )(*inputs)

    if S_pad != S:
        out = out[:, :, :S]
    return out


def feed_forward_ref(x, w1, b1, w2, b2):
    """Pure-JAX reference (dropout disabled / eval mode)."""
    xt = jnp.transpose(x, (0, 2, 1)).astype(jnp.float32)
    h = jnp.maximum(xt @ w1.T.astype(jnp.float32) + b1, 0.0)
    y = h @ w2.T.astype(jnp.float32) + b2
    return jnp.transpose(y, (0, 2, 1)).astype(x.dtype)


if __name__ == "__main__":
    # Small shapes consistent with the module: io_size=16, seq=8, hidden=128 (module default).
    B, IO, SEQ, HID = 2, 16, 8, 128
    DROP = 0.25

    key = jax.random.PRNGKey(0)
    kx, k1, k2, k3, k4, kdrop = jax.random.split(key, 6)

    # Torch-Linear-like uniform init: U(-1/sqrt(fan_in), 1/sqrt(fan_in)).
    bnd1 = 1.0 / math.sqrt(IO)
    bnd2 = 1.0 / math.sqrt(HID)
    w1 = jax.random.uniform(k1, (HID, IO), jnp.float32, -bnd1, bnd1)
    b1 = jax.random.uniform(k2, (HID,), jnp.float32, -bnd1, bnd1)
    w2 = jax.random.uniform(k3, (IO, HID), jnp.float32, -bnd2, bnd2)
    b2 = jax.random.uniform(k4, (IO,), jnp.float32, -bnd2, bnd2)

    x = jax.random.normal(kx, (B, IO, SEQ), jnp.float32)

    # Eval mode: must match the pure-JAX reference exactly (within tolerance).
    out_eval = feed_forward(x, w1, b1, w2, b2, drop_rate=0.0)
    out_eval = jax.block_until_ready(out_eval)
    ref = feed_forward_ref(x, w1, b1, w2, b2)
    assert out_eval.shape == (B, IO, SEQ)
    assert jnp.allclose(out_eval, ref, atol=1e-5, rtol=1e-5), "mismatch vs reference"

    # Training mode with dropout active (mask streamed in as uint32 bits).
    out_train = feed_forward(x, w1, b1, w2, b2, drop_rate=DROP, rng_key=kdrop)
    out_train = jax.block_until_ready(out_train)
    assert out_train.shape == (B, IO, SEQ)
    assert bool(jnp.all(jnp.isfinite(out_train)))

    print("KERNEL_OK")
</pallas_src>

<mosaic_0001>
module attributes {stable_mosaic.version = 11 : i64} {
  func.func @_ff_kernel_eval(%arg0: i32, %arg1: i32, %arg2: memref<1x16x8xf32, #tpu.memory_space<vmem>>, %arg3: memref<128x16xf32, #tpu.memory_space<vmem>>, %arg4: memref<128x1xf32, #tpu.memory_space<vmem>>, %arg5: memref<16x128xf32, #tpu.memory_space<vmem>>, %arg6: memref<16x1xf32, #tpu.memory_space<vmem>>, %arg7: memref<1x16x8xf32, #tpu.memory_space<vmem>>) attributes {dimension_semantics = [#tpu.dimension_semantics<parallel>, #tpu.dimension_semantics<parallel>], iteration_bounds = array<i64: 2, 1>, scalar_prefetch = 0 : i64, scratch_operands = 0 : i64, tpu.core_type = #tpu.core_type<tc>, window_params = [{transform_indices = @transform_0, window_bounds = array<i64: 1, 16, 8>}, {pipeline_mode = #tpu.pipeline_mode<synchronous>, transform_indices = @transform_1, window_bounds = array<i64: 128, 16>}, {pipeline_mode = #tpu.pipeline_mode<synchronous>, transform_indices = @transform_2, window_bounds = array<i64: 128, 1>}, {pipeline_mode = #tpu.pipeline_mode<synchronous>, transform_indices = @transform_3, window_bounds = array<i64: 16, 128>}, {pipeline_mode = #tpu.pipeline_mode<synchronous>, transform_indices = @transform_4, window_bounds = array<i64: 16, 1>}, {transform_indices = @transform_5, window_bounds = array<i64: 1, 16, 8>}]} {
    %c0 = arith.constant 0 : index
    %c0_0 = arith.constant 0 : index
    %c0_1 = arith.constant 0 : index
    %0 = vector.load %arg2[%c0, %c0_0, %c0_1] : memref<1x16x8xf32, #tpu.memory_space<vmem>>, vector<1x16x8xf32>
    %1 = vector.shape_cast %0 : vector<1x16x8xf32> to vector<16x8xf32>
    %c0_2 = arith.constant 0 : index
    %c0_3 = arith.constant 0 : index
    %2 = vector.load %arg3[%c0_2, %c0_3] : memref<128x16xf32, #tpu.memory_space<vmem>>, vector<128x16xf32>
    %cst = arith.constant dense<0.000000e+00> : vector<128x8xf32>
    %3 = tpu.matmul %2, %1, %cst {dimension_numbers = #tpu.dot_dimension_numbers<[1], [0], [0], [1], [0, 0, 1, 1], [], []>} : vector<128x16xf32>, vector<16x8xf32>, vector<128x8xf32> -> vector<128x8xf32>
    %c0_4 = arith.constant 0 : index
    %c0_5 = arith.constant 0 : index
    %4 = vector.load %arg4[%c0_4, %c0_5] : memref<128x1xf32, #tpu.memory_space<vmem>>, vector<128x1xf32>
    %5 = vector.broadcast %4 : vector<128x1xf32> to vector<128x8xf32>
    %6 = arith.addf %3, %5 : vector<128x8xf32>
    %cst_6 = arith.constant 0.000000e+00 : f32
    %7 = vector.broadcast %cst_6 : f32 to vector<128x8xf32>
    %8 = arith.maximumf %6, %7 : vector<128x8xf32>
    %c0_7 = arith.constant 0 : index
    %c0_8 = arith.constant 0 : index
    %9 = vector.load %arg5[%c0_7, %c0_8] : memref<16x128xf32, #tpu.memory_space<vmem>>, vector<16x128xf32>
    %cst_9 = arith.constant dense<0.000000e+00> : vector<16x8xf32>
    %10 = tpu.matmul %9, %8, %cst_9 {dimension_numbers = #tpu.dot_dimension_numbers<[1], [0], [0], [1], [0, 0, 1, 1], [], []>} : vector<16x128xf32>, vector<128x8xf32>, vector<16x8xf32> -> vector<16x8xf32>
    %c0_10 = arith.constant 0 : index
    %c0_11 = arith.constant 0 : index
    %11 = vector.load %arg6[%c0_10, %c0_11] : memref<16x1xf32, #tpu.memory_space<vmem>>, vector<16x1xf32>
    %12 = vector.broadcast %11 : vector<16x1xf32> to vector<16x8xf32>
    %13 = arith.addf %10, %12 : vector<16x8xf32>
    %c0_12 = arith.constant 0 : index
    %c0_13 = arith.constant 0 : index
    %c0_14 = arith.constant 0 : index
    %14 = vector.load %arg7[%c0_12, %c0_13, %c0_14] : memref<1x16x8xf32, #tpu.memory_space<vmem>>, vector<1x16x8xf32>
    %15 = vector.shape_cast %14 : vector<1x16x8xf32> to vector<16x8xf32>
    %16 = vector.shape_cast %13 : vector<16x8xf32> to vector<1x16x8xf32>
    tpu.vector_store %arg7[%c0_12, %c0_13, %c0_14], %16 {strides = array<i32>} : memref<1x16x8xf32, #tpu.memory_space<vmem>>, vector<1x16x8xf32>,
    return
  }
  func.func @transform_0(%arg0: i32, %arg1: i32) -> (i32, i32, i32) {
    %c0_i32 = arith.constant 0 : i32
    %c0_i32_0 = arith.constant 0 : i32
    return %arg0, %c0_i32, %arg1 : i32, i32, i32
  }
  func.func @transform_1(%arg0: i32, %arg1: i32) -> (i32, i32) {
    %c0_i32 = arith.constant 0 : i32
    %c0_i32_0 = arith.constant 0 : i32
    %c0_i32_1 = arith.constant 0 : i32
    return %c0_i32, %c0_i32_0 : i32, i32
  }
  func.func @transform_2(%arg0: i32, %arg1: i32) -> (i32, i32) {
    %c0_i32 = arith.constant 0 : i32
    %c0_i32_0 = arith.constant 0 : i32
    %c0_i32_1 = arith.constant 0 : i32
    return %c0_i32, %c0_i32_0 : i32, i32
  }
  func.func @transform_3(%arg0: i32, %arg1: i32) -> (i32, i32) {
    %c0_i32 = arith.constant 0 : i32
    %c0_i32_0 = arith.constant 0 : i32
    %c0_i32_1 = arith.constant 0 : i32
    return %c0_i32, %c0_i32_0 : i32, i32
  }
  func.func @transform_4(%arg0: i32, %arg1: i32) -> (i32, i32) {
    %c0_i32 = arith.constant 0 : i32
    %c0_i32_0 = arith.constant 0 : i32
    %c0_i32_1 = arith.constant 0 : i32
    return %c0_i32, %c0_i32_0 : i32, i32
  }
  func.func @transform_5(%arg0: i32, %arg1: i32) -> (i32, i32, i32) {
    %c0_i32 = arith.constant 0 : i32
    %c0_i32_0 = arith.constant 0 : i32
    return %arg0, %c0_i32, %arg1 : i32, i32, i32
  }
}

</mosaic_0001>

<bundles_post_ra>
// kernel: tpu_custom_call.1
= control target key start
LH: loop header
LB: loop body
LE: loop exit
PB: predicated region body
PF: predicated region fallthrough
CT: control target
= control target key end

     0   :  { %s965_s18 = smov 0   ;;  %s967_s19 = smov 0   ;;  %s1141_s0 = inlined_call_operand.vmem [shape: f32[2,16,8], index: 0, kind: input, shape index: {}]   ;;  %s1142_s1 = inlined_call_operand.vmem [shape: f32[128,16], index: 1, kind: input, shape index: {}]   ;;  %s1143_s2 = inlined_call_operand.vmem [shape: f32[128,1], index: 2, kind: input, shape index: {}]   ;;  %s1144_s3 = inlined_call_operand.vmem [shape: f32[16,128], index: 3, kind: input, shape index: {}]   ;;  %s1145_s4 = inlined_call_operand.vmem [shape: f32[16,1], index: 4, kind: input, shape index: {}]   ;;  %s1146_s5 = inlined_call_operand.vmem [shape: f32[2,16,8], index: 5, kind: output, shape index: {}]  }
   0x1   :  { %s969_s20 = smov 0  }
   0x2 LB: > { %s27_s21 = sadd.s32 1, %s928_s19  ;;  %p759_p0 = scmp.ge.s32.totalorder %s932_s20, 1  ;;  %s932_s20 = sphi %s969_s20, %s15_s20   ;;  %s928_s19 = sphi %s967_s19, %s1148_s19   ;;  %s924_s18 = sphi %s965_s18, %s1147_s18  }
   0x3   : > { %p29_p1 = scmp.ge.s32.totalorder %s27_s21, 2  ;;  %p206_p2 = scmp.lt.s32.totalorder %s932_s20, 3 }
   0x5   : > { %s1150_s21 = smov (%p29_p1, %s27_s21), 0  ;;  %p207_p3 = pnand %p759_p0, %p206_p2 }
   0x6   : > { %p240_p4 = scmp.lt.s32.totalorder (!%p207_p3), %s924_s18, 1 }
   0x7   : > { %210 = sbr.rel (%p207_p3) target bundleno = 475 (0x1db), region = 40 }
   0xc   : > { %v258_v0 = vld [vmem:[%s1142_s1] sm:$0xff]  ;;  %vm370_vm0 = vcmask 130048   ;;  %v934_v1 = vmov 0   ;;  %s1152_s18 = smov (!%p240_p4, %s924_s18), 1  ;;  %v289_v2 = vld [vmem:[%s1143_s2 + $0x78] sm:$0xff]  ;;  %v287_v3 = vld [vmem:[%s1143_s2 + $0x68] sm:$0xff] }
   0xd   : > { %824 = vmatprep.mubr.msk.f32.mxu0 %vm370_vm0, %v258_v0  ;;  %908 = vset.pattern.permute.xlu0 %v934_v1  ;;  %s782_s24 = sshll.u32 %s1152_s18, 4  ;;  %v288_v6 = vld [vmem:[%s1143_s2 + $0x70] sm:$0xff]  ;;  %v259_v7 = vld [vmem:[%s1142_s1 + $0x8] sm:$0xff]  ;;  %v286_v8 = vld [vmem:[%s1143_s2 + $0x60] sm:$0xff]  ;;  %vm669_vm1 = vcmask 64512  }
   0xe   : > { %909 = vset.pattern.permute.xlu1 %v934_v1  ;;  %s247_s27 = scalar_lea.vmem %s1141_s0, %s782_s24  ;;  %367 = vperm.xlu0 %908, %v289_v2   ;;  %v260_v9 = vld [vmem:[%s1142_s1 + $0x10] sm:$0xff]  ;;  %v285_v10 = vld [vmem:[%s1143_s2 + $0x58] sm:$0xff]  ;;  %v262_v13 = vld [vmem:[%s1142_s1 + $0x20] sm:$0xff]  ;;  %s255_s15 = scalar_lea.vmem %s1146_s5, %s782_s24 }
   0xf   : > { %v257_v4 = vld [vmem:[%s247_s27 + $0x8] sm:$0xff]  ;;  %v256_v5 = vld [vmem:[%s247_s27] sm:$0xff]  ;;  %357 = vperm.xlu1 %909, %v287_v3   ;;  %v261_v11 = vld [vmem:[%s1142_s1 + $0x18] sm:$0xff] }
  0x10   : > { %820 = vmatprep.subr.mxu0 %v257_v4  ;;  %v284_v12 = vld [vmem:[%s1143_s2 + $0x50] sm:$0xff]  ;;  %v283_v14 = vld [vmem:[%s1143_s2 + $0x48] sm:$0xff]  ;;  %v282_v16 = vld [vmem:[%s1143_s2 + $0x40] sm:$0xff] }
  0x11   : > { %821 = vmatpush3.msra.mxu0 %v257_v4  ;;  %v263_v15 = vld [vmem:[%s1142_s1 + $0x28] sm:$0xff]  ;;  %v264_v17 = vld [vmem:[%s1142_s1 + $0x30] sm:$0xff]  ;;  %v281_v18 = vld [vmem:[%s1143_s2 + $0x38] sm:$0xff] }
  0x12   : > { %822 = vmatprep.subr.mxu0 %v256_v5  ;;  %362 = vperm.xlu0 %908, %v288_v6   ;;  %v265_v19 = vld [vmem:[%s1142_s1 + $0x38] sm:$0xff]  ;;  %v280_v20 = vld [vmem:[%s1143_s2 + $0x30] sm:$0xff]  ;;  %v266_v21 = vld [vmem:[%s1142_s1 + $0x40] sm:$0xff] }
  0x13   : > { %823 = vmatpush3.msra.mxu0 %v256_v5  ;;  %352 = vperm.xlu1 %909, %v286_v8   ;;  %v279_v22 = vld [vmem:[%s1143_s2 + $0x28] sm:$0xff]  ;;  %v278_v24 = vld [vmem:[%s1143_s2 + $0x20] sm:$0xff]  ;;  %v268_v25 = vld [vmem:[%s1142_s1 + $0x50] sm:$0xff] }
  0x14   : > { %825 = vmatmul.mubr.msk.f32.vlgmr.msra.gmra.mxu0 %vm370_vm0, %v259_v7  ;;  %v267_v23 = vld [vmem:[%s1142_s1 + $0x48] sm:$0xff]  ;;  %v277_v26 = vld [vmem:[%s1143_s2 + $0x18] sm:$0xff]  ;;  %v276_v28 = vld [vmem:[%s1143_s2 + $0x10] sm:$0xff] }
  0x15   : > { %827 = vmatprep.mubr.msk.f32.mxu0 %vm370_vm0, %v260_v9  ;;  %v269_v27 = vld [vmem:[%s1142_s1 + $0x58] sm:$0xff]  ;;  %v270_v29 = vld [vmem:[%s1142_s1 + $0x60] sm:$0xff]  ;;  %v275_v30 = vld [vmem:[%s1143_s2 + $0x8] sm:$0xff] }
  0x16   : > { %347 = vperm.xlu0 %908, %v285_v10   ;;  %v271_v31 = vld [vmem:[%s1142_s1 + $0x68] sm:$0xff]  ;;  %v274_v32 = vld [vmem:[%s1143_s2] sm:$0xff]  ;;  %v272_v33 = vld [vmem:[%s1142_s1 + $0x70] sm:$0xff] }
  0x17   : > { %342 = vperm.xlu1 %909, %v284_v12   ;;  %v582_v34 = vld [vmem:[%s1145_s4] sm:$0xff]  ;;  %v273_v35 = vld [vmem:[%s1142_s1 + $0x78] sm:$0xff]  ;;  %v583_v36 = vld [vmem:[%s1145_s4 + $0x8] sm:$0xff] }
  0x18   : > { %828 = vmatmul.mubr.msk.f32.gmra.mxu0 %vm370_vm0, %v261_v11  ;;  %v580_v37 = vld [vmem:[%s1144_s3] sm:$0xff] }
  0x19   : > { %830 = vmatprep.mubr.msk.f32.mxu0 %vm370_vm0, %v262_v13  ;;  %880 = vmatprep.mubr.f32.mxu1 %v580_v37 }
  0x1a   : > { %337 = vperm.xlu0 %908, %v283_v14  }
  0x1b   : > { %332 = vperm.xlu1 %909, %v282_v16  }
  0x1c   : > { %831 = vmatmul.mubr.msk.f32.gmra.mxu0 %vm370_vm0, %v263_v15 }
  0x1d   : > { %833 = vmatprep.mubr.msk.f32.mxu0 %vm370_vm0, %v264_v17 }
  0x1e   : > { %327 = vperm.xlu0 %908, %v281_v18  }
  0x1f   : > { %322 = vperm.xlu1 %909, %v280_v20  }
  0x20   : > { %834 = vmatmul.mubr.msk.f32.gmra.mxu0 %vm370_vm0, %v265_v19 }
  0x21   : > { %836 = vmatprep.mubr.msk.f32.mxu0 %vm370_vm0, %v266_v21 }
  0x22   : > { %317 = vperm.xlu0 %908, %v279_v22  }
  0x23   : > { %312 = vperm.xlu1 %909, %v278_v24  }
  0x24   : > { %837 = vmatmul.mubr.msk.f32.gmra.mxu0 %vm370_vm0, %v267_v23 }
  0x25   : > { %839 = vmatprep.mubr.msk.f32.mxu0 %vm370_vm0, %v268_v25 }
  0x26   : > { %307 = vperm.xlu0 %908, %v277_v26  }
  0x27   : > { %302 = vperm.xlu1 %909, %v276_v28  }
  0x28   : > { %840 = vmatmul.mubr.msk.f32.gmra.mxu0 %vm370_vm0, %v269_v27 }
  0x29   : > { %842 = vmatprep.mubr.msk.f32.mxu0 %vm370_vm0, %v270_v29 }
  0x2a   : > { %297 = vperm.xlu0 %908, %v275_v30  }
  0x2b   : > { %292 = vperm.xlu1 %909, %v274_v32  }
  0x2c   : > { %843 = vmatmul.mubr.msk.f32.gmra.mxu0 %vm370_vm0, %v271_v31 }
  0x2d   : > { %845 = vmatprep.mubr.msk.f32.mxu0 %vm370_vm0, %v272_v33 }
  0x2e   : > { %586 = vperm.xlu0 %908, %v582_v34  }
  0x2f   : > { %591 = vperm.xlu1 %909, %v583_v36  }
  0x30   : > { %846 = vmatmul.mubr.msk.f32.gmra.mxu0 %vm370_vm0, %v273_v35 }
  0x89   : > { %v368_v43 = vpop.permute.xlu0 %367 }
  0x8a   : > { %v358_v45 = vpop.permute.xlu1 %357 }
  0x8d   : > { %v363_v48 = vpop.permute.xlu0 %362 }
  0x8e   : > { %v353_v50 = vpop.permute.xlu1 %352 }
  0x91   : > { %v348_v53 = vpop.permute.xlu0 %347 }
  0x92   : > { %v343_v55 = vpop.permute.xlu1 %342 }
  0x95   : > { %v338_v58 = vpop.permute.xlu0 %337 }
  0x96   : > { %v333_v61 = vpop.permute.xlu1 %332 }
  0x99   : > { %v328_v4 = vpop.permute.xlu0 %327 }
  0x9a   : > { %v323_v7 = vpop.permute.xlu1 %322 }
  0x9d   : > { %v318_v12 = vpop.permute.xlu0 %317 }
  0x9e   : > { %v313_v15 = vpop.permute.xlu1 %312 }
  0xa1   : > { %v308_v20 = vpop.permute.xlu0 %307 }
  0xa2   : > { %v303_v23 = vpop.permute.xlu1 %302 }
  0xa5   : > { %v298_v28 = vpop.permute.xlu0 %297 }
  0xa6   : > { %v293_v31 = vpop.permute.xlu1 %292 }
  0xd4   : > { %v1112_v38 = vpop.f32.mrf.mxu0 }
  0xd5   : > { %v491_v32 = vadd.f32 %v1112_v38, %v298_v28  ;;  %v592_v38 = vpop.permute.xlu1 %591 }
  0xd6   : > { %v1114_v39 = vpop.f32.mrf.mxu0 }
  0xd7   : > { %v486_v34 = vadd.f32 %v1114_v39, %v293_v31  ;;  %v565_v36 = vmax.f32 %v491_v32, 0.0 }
  0xd8   : > { %v1116_v40 = vpop.f32.mrf.mxu0 }
  0xd9   : > { %v501_v26 = vadd.f32 %v1116_v40, %v308_v20  ;;  %v564_v37 = vmax.f32 %v486_v34, 0.0  ;;  %v581_v40 = vld [vmem:[%s1144_s3 + $0x8] sm:$0xff] }
  0xda   : > { %v1118_v41 = vpop.f32.mrf.mxu0 }
  0xdb   : > { %v496_v29 = vadd.f32 %v1118_v41, %v303_v23  ;;  %v567_v33 = vmax.f32 %v501_v26, 0.0 }
  0xdc   : > { %v832_v42 = vpop.f32.mrf.mxu0 }
  0xdd   : > { %v511_v21 = vadd.f32 %v832_v42, %v318_v12  ;;  %v566_v35 = vmax.f32 %v496_v29, 0.0  ;;  %v587_v42 = vpop.permute.xlu0 %586 }
  0xde   : > { %v505_v44 = vpop.f32.mrf.mxu0 }
  0xdf   : > { %v506_v24 = vadd.f32 %v505_v44, %v313_v15  ;;  %v569_v27 = vmax.f32 %v511_v21, 0.0 }
  0xe0   : > { %v835_v46 = vpop.f32.mrf.mxu0 }
  0xe1   : > { %v521_v16 = vadd.f32 %v835_v46, %v328_v4  ;;  %v568_v30 = vmax.f32 %v506_v24, 0.0 }
  0xe2   : > { %v515_v47 = vpop.f32.mrf.mxu0 }
  0xe3   : > { %v516_v18 = vadd.f32 %v515_v47, %v323_v7  ;;  %v571_v22 = vmax.f32 %v521_v16, 0.0 }
  0xe4   : > { %v838_v49 = vpop.f32.mrf.mxu0 }
  0xe5   : > { %v531_v10 = vadd.f32 %v838_v49, %v338_v58  ;;  %v570_v25 = vmax.f32 %v516_v18, 0.0 }
  0xe6   : > { %v525_v51 = vpop.f32.mrf.mxu0 }
  0xe7   : > { %v526_v13 = vadd.f32 %v525_v51, %v333_v61  ;;  %v573_v17 = vmax.f32 %v531_v10, 0.0 }
  0xe8   : > { %v841_v52 = vpop.f32.mrf.mxu0 }
  0xe9   : > { %v541_v5 = vadd.f32 %v841_v52, %v348_v53  ;;  %v572_v19 = vmax.f32 %v526_v13, 0.0 }
  0xea   : > { %v535_v54 = vpop.f32.mrf.mxu0 }
  0xeb   : > { %v536_v8 = vadd.f32 %v535_v54, %v343_v55  ;;  %v575_v11 = vmax.f32 %v541_v5, 0.0 }
  0xec   : > { %v844_v56 = vpop.f32.mrf.mxu0 }
  0xed   : > { %v551_v63 = vadd.f32 %v844_v56, %v358_v45  ;;  %v574_v14 = vmax.f32 %v536_v8, 0.0 }
  0xee   : > { %v545_v57 = vpop.f32.mrf.mxu0 }
  0xef   : > { %v546_v2 = vadd.f32 %v545_v57, %v353_v50  ;;  %v577_v6 = vmax.f32 %v551_v63, 0.0 }
  0xf0   : > { %v847_v59 = vpop.f32.mrf.mxu0 }
  0xf1   : > { %v561_v60 = vadd.f32 %v847_v59, %v368_v43  ;;  %v576_v9 = vmax.f32 %v546_v2, 0.0 }
  0xf2   : > { %v555_v62 = vpop.f32.mrf.mxu0 }
  0xf3   : > { %v579_v0 = vmax.f32 %v561_v60, 0.0  ;;  %v556_v1 = vadd.f32 %v555_v62, %v363_v48 }
  0xf5   : > { %v578_v3 = vmax.f32 %v556_v1, 0.0  ;;  %848 = vmatprep.subr.mxu1 %v579_v0 }
  0xf6   : > { %849 = vmatpush3.msra.mxu1 %v579_v0 }
  0xf7   : > { %850 = vmatprep.subr.mxu1 %v578_v3 }
  0xf8   : > { %851 = vmatpush3.msra.mxu1 %v578_v3 }
  0xf9   : > { %852 = vmatprep.subr.mxu1 %v577_v6 }
  0xfa   : > { %853 = vmatpush3.msra.mxu1 %v577_v6 }
  0xfb   : > { %854 = vmatprep.subr.mxu1 %v576_v9 }
  0xfc   : > { %855 = vmatpush3.msra.mxu1 %v576_v9 }
  0xfd   : > { %856 = vmatprep.subr.mxu1 %v575_v11 }
  0xfe   : > { %857 = vmatpush3.msra.mxu1 %v575_v11 }
  0xff   : > { %858 = vmatprep.subr.mxu1 %v574_v14 }
 0x100   : > { %859 = vmatpush3.msra.mxu1 %v574_v14 }
 0x101   : > { %860 = vmatprep.subr.mxu1 %v573_v17 }
 0x102   : > { %861 = vmatpush3.msra.mxu1 %v573_v17 }
 0x103   : > { %862 = vmatprep.subr.mxu1 %v572_v19 }
 0x104   : > { %863 = vmatpush3.msra.mxu1 %v572_v19 }
 0x105   : > { %864 = vmatprep.subr.mxu1 %v571_v22 }
 0x106   : > { %865 = vmatpush3.msra.mxu1 %v571_v22 }
 0x107   : > { %866 = vmatprep.subr.mxu1 %v570_v25 }
 0x108   : > { %867 = vmatpush3.msra.mxu1 %v570_v25 }
 0x109   : > { %868 = vmatprep.subr.mxu1 %v569_v27 }
 0x10a   : > { %869 = vmatpush3.msra.mxu1 %v569_v27 }
 0x10b   : > { %870 = vmatprep.subr.mxu1 %v568_v30 }
 0x10c   : > { %871 = vmatpush3.msra.mxu1 %v568_v30 }
 0x10d   : > { %872 = vmatprep.subr.mxu1 %v567_v33 }
 0x10e   : > { %873 = vmatpush3.msra.mxu1 %v567_v33 }
 0x10f   : > { %874 = vmatprep.subr.mxu1 %v566_v35 }
 0x110   : > { %875 = vmatpush3.msra.mxu1 %v566_v35 }
 0x111   : > { %876 = vmatprep.subr.mxu1 %v565_v36 }
 0x112   : > { %877 = vmatpush3.msra.mxu1 %v565_v36 }
 0x113   : > { %878 = vmatprep.subr.mxu1 %v564_v37 }
 0x114   : > { %879 = vmatpush3.msra.mxu1 %v564_v37 }
 0x115   : > { %881 = vmatmul.mubr.f32.vlgmr.msra.gmra.mxu1 %v581_v40 }
 0x1d5   : > { %v882_v39 = vpop.f32.mrf.mxu1 }
 0x1d6   : > { %v666_v41 = vadd.f32 %v882_v39, %v592_v38 }
 0x1d7   : > { %v660_v43 = vpop.f32.mrf.mxu1 }
 0x1d8   : > { %671 = vst.msk [vmem:[%s255_s15 + $0x8] sm:$0xff] %vm669_vm1, %v666_v41  ;;  %v661_v44 = vadd.f32 %v660_v43, %v587_v42 }
 0x1da   : > { %670 = vst.msk [vmem:[%s255_s15] sm:$0xff] %vm669_vm1, %v661_v44 }
 0x1db PF: > { %s15_s20 = sadd.s32 1, %s932_s20   ;;  %s1147_s18 = smov %s928_s19 }
 0x1dc   : > { %p12_p5 = scmp.ge.s32.totalorder %s15_s20, 4   ;;  %s1148_s19 = smov %s1150_s21 }
 0x1de   :  { %14 = sbr.rel (!%p12_p5) target bundleno = 2 (0x2), region = 70 }

</bundles_post_ra>
